<compile_context>
chip_gen: v5e
topology: v5e:2x2
jax: 0.10.0
libtpu: 0.0.40
codegen_flags: <defaults>
</compile_context>

<pallas_src>
import jax
import jax.numpy as jnp
from jax.experimental import pallas as pl
from jax.experimental.pallas import tpu as pltpu

_LANES = 128
_SUBLANES = 8
# 4 pipeline buffers (input + output, each double-buffered).  12 MiB keeps the
# footprint under v5e's 16 MiB scoped-VMEM default (no vmem_limit override
# needed) while staying on the flat part of the HBM roofline.
_VMEM_BUDGET_BYTES = 12 * 1024 * 1024


def _relu_kernel(a_ref, o_ref):
    # Pure VPU elementwise: one vreg-wide max per (8, 128) tile.
    o_ref[...] = jnp.maximum(a_ref[...], jnp.zeros((), a_ref.dtype))


def _round_up(x, mult):
    return ((x + mult - 1) // mult) * mult


def _choose_row_tile(rows, cols, itemsize):
    """Largest row tile (multiple of 8) that fits the 4-buffer VMEM budget,
    then split so the grid has >= 2 steps when possible (keeps both v7x
    TensorCores busy; costs only ~0.35us on single-TC chips)."""
    bytes_per_row = 4 * cols * itemsize
    max_rows = max(
        _SUBLANES,
        (int(_VMEM_BUDGET_BYTES // bytes_per_row) // _SUBLANES) * _SUBLANES,
    )
    rows_pad = _round_up(rows, _SUBLANES)
    row_tile = min(max_rows, rows_pad)
    if pl.cdiv(rows, row_tile) < 2 and rows_pad >= 2 * _SUBLANES:
        row_tile = max(_SUBLANES, _round_up(rows_pad // 2, _SUBLANES))
    return row_tile


def _relu_2d(x):
    rows, cols = x.shape
    itemsize = jnp.dtype(x.dtype).itemsize
    row_tile = _choose_row_tile(rows, cols, itemsize)
    return pl.pallas_call(
        _relu_kernel,
        out_shape=jax.ShapeDtypeStruct((rows, cols), x.dtype),
        grid_spec=pltpu.PrefetchScalarGridSpec(
            num_scalar_prefetch=0,
            grid=(pl.cdiv(rows, row_tile),),
            # Minor dim = full array width -> legal BlockSpec for any cols;
            # ragged last row block is masked automatically (no pad/slice).
            in_specs=[pl.BlockSpec((row_tile, cols), lambda i: (i, 0))],
            out_specs=pl.BlockSpec((row_tile, cols), lambda i: (i, 0)),
        ),
        compiler_params=pltpu.CompilerParams(
            dimension_semantics=("parallel",)),
    )(x)


def graph_global_pallas(A, idx=None):
    """Forward of `graph_global`: relu(A).  `idx` is accepted and ignored."""
    del idx  # unused, matching the PyTorch module's forward signature
    n, m = A.shape
    total = n * m
    if m % _LANES != 0 and total % (_SUBLANES * _LANES) == 0:
        # Lane-dense flat view: free reshape of the contiguous row-major
        # buffer so every store is an unmasked vst even for awkward widths.
        cols = _SUBLANES * _LANES
        out = _relu_2d(A.reshape(total // cols, cols))
        return out.reshape(n, m)
    # Either already lane-dense (m % 128 == 0) or a ragged width that cannot
    # be flattened: the cdiv grid + masked lane tail handles it correctly.
    return _relu_2d(A)


def graph_global_ref(A, idx=None):
    """Pure-JAX reference replicating the PyTorch forward exactly."""
    del idx
    return jnp.maximum(A, 0.0)


if __name__ == "__main__":
    key = jax.random.PRNGKey(0)

    # Small demo shapes exercising all three wrapper paths:
    #   128 -> lane-dense direct, 207 -> ragged masked tail, 96 -> flat view.
    for nnodes in (128, 207, 96):
        k, key = jax.random.split(key)
        # A ~ randn(nnodes, nnodes), same init distribution as the PyTorch module.
        A = jax.random.normal(k, (nnodes, nnodes), dtype=jnp.float32)
        idx = jnp.arange(nnodes, dtype=jnp.int32)  # unused (signature parity)

        out = jax.block_until_ready(graph_global_pallas(A, idx))
        ref = graph_global_ref(A, idx)

        assert out.shape == ref.shape == (nnodes, nnodes), (nnodes, out.shape)
        assert jnp.array_equal(out, ref), float(jnp.max(jnp.abs(out - ref)))

    print("KERNEL_OK")
</pallas_src>

<mosaic_0001>
module attributes {stable_mosaic.version = 11 : i64} {
  func.func @_relu_kernel(%arg0: i32, %arg1: memref<64x128xf32, #tpu.memory_space<vmem>>, %arg2: memref<64x128xf32, #tpu.memory_space<vmem>>) attributes {dimension_semantics = [#tpu.dimension_semantics<parallel>], iteration_bounds = array<i64: 2>, scalar_prefetch = 0 : i64, scratch_operands = 0 : i64, tpu.core_type = #tpu.core_type<tc>, window_params = [{transform_indices = @transform_0, window_bounds = array<i64: 64, 128>}, {transform_indices = @transform_1, window_bounds = array<i64: 64, 128>}]} {
    %c0 = arith.constant 0 : index
    %c0_0 = arith.constant 0 : index
    %0 = vector.load %arg1[%c0, %c0_0] : memref<64x128xf32, #tpu.memory_space<vmem>>, vector<64x128xf32>
    %cst = arith.constant 0.000000e+00 : f32
    %1 = vector.broadcast %cst : f32 to vector<64x128xf32>
    %2 = arith.maximumf %0, %1 : vector<64x128xf32>
    %c0_1 = arith.constant 0 : index
    %c0_2 = arith.constant 0 : index
    %3 = vector.load %arg2[%c0_1, %c0_2] : memref<64x128xf32, #tpu.memory_space<vmem>>, vector<64x128xf32>
    tpu.vector_store %arg2[%c0_1, %c0_2], %2 {strides = array<i32>} : memref<64x128xf32, #tpu.memory_space<vmem>>, vector<64x128xf32>,
    return
  }
  func.func @transform_0(%arg0: i32) -> (i32, i32) {
    %c0_i32 = arith.constant 0 : i32
    %c0_i32_0 = arith.constant 0 : i32
    return %arg0, %c0_i32 : i32, i32
  }
  func.func @transform_1(%arg0: i32) -> (i32, i32) {
    %c0_i32 = arith.constant 0 : i32
    %c0_i32_0 = arith.constant 0 : i32
    return %arg0, %c0_i32 : i32, i32
  }
}

</mosaic_0001>

<bundles_post_ra>
// kernel: tpu_custom_call.1
= control target key start
LH: loop header
LB: loop body
LE: loop exit
PB: predicated region body
PF: predicated region fallthrough
CT: control target
= control target key end

     0   :  { %6 = vsyncpa [#allocation3], 0  ;;  %s557_s0 = inlined_call_operand.hbm [shape: f32[128,128], index: 0, kind: input, shape index: {}]   ;;  %s558_s1 = inlined_call_operand.hbm [shape: f32[128,128], index: 1, kind: output, shape index: {}]  }
   0x1   :  { %8 = vsyncpa [#allocation3 + $0x1], 0 }
   0x2   :  { %9 = vsyncpa [#allocation4], 0 }
   0x3   :  { %11 = vsyncpa [#allocation4 + $0x1], 0  ;;  %s430_s6 = smov 0   ;;  %s432_s7 = smov 0  }
   0x4   :  { %s434_s8 = smov 0   ;;  %s436_s9 = smov 0  }
   0x5 LB: > { %s451_s10 = sadd.s32 4294967295, %s414_s9   ;;  %s252_s11 = sadd.s32 4294967294, %s414_s9   ;;  %s414_s9 = sphi %s436_s9, %s568_s9   ;;  %s410_s8 = sphi %s434_s8, %s567_s8   ;;  %s406_s7 = sphi %s432_s7, %s566_s7   ;;  %s402_s6 = sphi %s430_s6, %s565_s6  }
   0x6   : > { %s455_s12 = sadd.s32 1, %s414_s9   ;;  %s24_s13 = sadd.s32 1, %s410_s8 }
   0x7   : > { %s21_s14 = ssub.s32 %s414_s9, %s455_s12  ;;  %p31_p0 = scmp.ne.s32.totalorder %s410_s8, %s406_s7 }
   0x8   : > { %p22_p1 = scmp.eq.s32.totalorder %s21_s14, 0  ;;  %p32_p2 = scmp.eq.s32.totalorder %s414_s9, 0 }
   0x9   : > { %p37_p3 = scmp.ne.s32.totalorder %s406_s7, %s402_s6  ;;  %p38_p4 = scmp.eq.s32.totalorder %s451_s10, 0 }
   0xa   : > { %s467_s15 = scalar_select %p22_p1, %s410_s8, %s24_s13  }
   0xb   : > { %p469_p5 = por %p32_p2, %p31_p0  ;;  %p473_p6 = por %p38_p4, %p37_p3 }
   0xc   : > { %p61_p7 = scmp.eq.s32.totalorder %s451_s10, 1  ;;  %p67_p8 = scmp.eq.s32.totalorder %s252_s11, 1 }
   0xd   : > { %p280_p10 = scmp.lt.s32.totalorder %s414_s9, 2  ;;  %s87_s20 = sand.u32 1, %s410_s8  }
   0xe   : > { %p480_p11 = por %p61_p7, %p31_p0  ;;  %p484_p12 = por %p67_p8, %p37_p3 }
   0xf   : > { %s266_s21 = sshll.u32 %s414_s9, 6  ;;  %s255_s22 = sshll.u32 %s87_s20, 6 }
  0x10   : > { %s96_s25 = scalar_lea.hbm %s557_s0, %s266_s21  ;;  %s91_s27 = scalar_lea.vmem [#allocation2], %s255_s22 }
  0x11   : > { %s97_s26 = sshll.u32 %s96_s25, 4  ;;  %s99_s28 = sshll.u32 %s91_s27, 4  ;;  %s98_s26 = int_to_ptr.hbm [resolvable:$true] %s97_s26  ;;  %s100_s28 = int_to_ptr.vmem [resolvable:$true] %s99_s28 }
  0x12   : > { %p495_p13 = pnand %p280_p10, %p469_p5  ;;  %p258_p0 = scmp.ge.s32.totalorder %s414_s9, 1 }
  0x13   : > { %p107_p1 = scmp.lt.s32.totalorder %s414_s9, 3  ;;  %s88_s30 = scalar_lea.sflag [#allocation3], %s87_s20 }
  0x14   : > { %s318_s2 = sshra.s32 %s98_s26, 4  ;;  %p322_p3 = pneg %p495_p13  ;;  %s319_s2 = int_to_ptr.hbm [resolvable:$true] %s318_s2 }
  0x15   : > { %s320_s3 = scalar_lea.hbm %s319_s2, 64  ;;  %s325_s11 = scalar_lea.hbm %s557_s0, 128 }
  0x16   : > { %p321_p2 = scmp.ne.s32.totalorder %s319_s2, %s320_s3  ;;  %p326_p5 = scmp.lt.s32.totalorder %s319_s2, %s557_s0 }
  0x17   : > { %p327_p8 = scmp.lt.s32.totalorder %s325_s11, %s320_s3 }
  0x18   : > { %p323_p4 = pnand %p322_p3, %p321_p2 }
  0x19   : > { %p328_p10 = por %p327_p8, %p326_p5 }
  0x1a   : > { %p324_p7 = pneg %p323_p4 }
  0x1c   : > { %p329_p9 = pnand %p328_p10, %p324_p7 }
  0x1e   : > { %332 = shalt.err (!%p329_p9)
}
  0x1f   : > { %s416_s16 = smov 128   ;;  %s417_s20 = smov 8  }
  0x20   : > { %275 = dma.hbm_to_vmem [thread:$0]  (!%p495_p13), %s98_s26, 1024, %s100_s28, %s88_s30, %s416_s16, %s416_s16, %s417_s20  }
  0x21   : > { %p108_p2 = pnand %p258_p0, %p107_p1 }
  0x22   : > { %s516_s21 = sand.u32 (!%p108_p2), 1, %s406_s7  }
  0x23   : > { %111 = sbr.rel (%p108_p2) target bundleno = 58 (0x3a), region = 24  ;;  %s259_s22 = sshll.u32 (!%p108_p2), %s516_s21, 6 }
  0x24   : > { %s114_s23 = scalar_lea.sflag (!%p108_p2), [#allocation3], %s516_s21  ;;  %s117_s24 = scalar_lea.vmem (!%p108_p2), [#allocation2], %s259_s22 }
  0x28   : > { %393 = dma.done.wait (%p473_p6), %s114_s23, 1024  }
  0x29   : > { %395 = vsyncadd (%p473_p6), %s114_s23, 4294966272  ;;  %s267_s25 = sshll.u32 %s451_s10, 6  ;;  %v139_v0 = vld [vmem:[%s117_s24] sm:$0xff]  ;;  %v140_v1 = vld [vmem:[%s117_s24 + $0x8] sm:$0xff]  ;;  %s136_s29 = scalar_lea.vmem [#allocation5], %s259_s22 }
  0x2a   : > { %v141_v2 = vld [vmem:[%s117_s24 + $0x10] sm:$0xff]  ;;  %v147_v3 = vmax.f32 %v139_v0, 0.0  ;;  %v148_v4 = vmax.f32 %v140_v1, 0.0  ;;  %v142_v6 = vld [vmem:[%s117_s24 + $0x18] sm:$0xff]  ;;  %v143_v7 = vld [vmem:[%s117_s24 + $0x20] sm:$0xff]  ;;  %s175_s28 = scalar_lea.hbm %s558_s1, %s267_s25  ;;  %s176_s10 = sshll.u32 %s136_s29, 4  ;;  %s177_s10 = int_to_ptr.vmem [resolvable:$true] %s176_s10 }
  0x2b   : > { %v149_v5 = vmax.f32 %v141_v2, 0.0  ;;  %v144_v8 = vld [vmem:[%s117_s24 + $0x28] sm:$0xff]  ;;  %v150_v9 = vmax.f32 %v142_v6, 0.0  ;;  %v145_v10 = vld [vmem:[%s117_s24 + $0x30] sm:$0xff]  ;;  %v151_v11 = vmax.f32 %v143_v7, 0.0  ;;  %v146_v12 = vld [vmem:[%s117_s24 + $0x38] sm:$0xff] }
  0x2c   : > { %155 = vst [vmem:[%s136_s29] sm:$0xff] %v147_v3  ;;  %v152_v13 = vmax.f32 %v144_v8, 0.0  ;;  %v153_v14 = vmax.f32 %v145_v10, 0.0  ;;  %s178_s17 = sshll.u32 %s175_s28, 4  ;;  %v154_v15 = vmax.f32 %v146_v12, 0.0  ;;  %s164_s30 = scalar_lea.sflag [#allocation4], %s516_s21  ;;  %s179_s17 = int_to_ptr.hbm [resolvable:$true] %s178_s17 }
  0x2d   : > { %156 = vst [vmem:[%s136_s29 + $0x8] sm:$0xff] %v148_v4  ;;  %s362_s2 = sshra.s32 %s179_s17, 4  ;;  %s368_s11 = scalar_lea.hbm %s558_s1, 128  ;;  %s363_s2 = int_to_ptr.hbm [resolvable:$true] %s362_s2 }
  0x2e   : > { %157 = vst [vmem:[%s136_s29 + $0x10] sm:$0xff] %v149_v5  ;;  %s364_s3 = scalar_lea.hbm %s363_s2, 64  ;;  %p369_p0 = scmp.lt.s32.totalorder %s363_s2, %s558_s1 }
  0x2f   : > { %158 = vst [vmem:[%s136_s29 + $0x18] sm:$0xff] %v150_v9  ;;  %p365_p6 = scmp.ne.s32.totalorder %s363_s2, %s364_s3  ;;  %p370_p1 = scmp.lt.s32.totalorder %s368_s11, %s364_s3 }
  0x30   : > { %159 = vst [vmem:[%s136_s29 + $0x20] sm:$0xff] %v151_v11 }
  0x31   : > { %160 = vst [vmem:[%s136_s29 + $0x28] sm:$0xff] %v152_v13  ;;  %p366_p9 = pnand %p365_p6, %p480_p11  ;;  %p371_p3 = por %p370_p1, %p369_p0 }
  0x32   : > { %161 = vst [vmem:[%s136_s29 + $0x30] sm:$0xff] %v153_v14 }
  0x33   : > { %162 = vst [vmem:[%s136_s29 + $0x38] sm:$0xff] %v154_v15  ;;  %p367_p13 = pneg %p366_p9 }
  0x35   : > { %p372_p4 = pnand %p371_p3, %p367_p13 }
  0x37   : > { %375 = shalt.err (!%p372_p4)
}
  0x38   : > { %s418_s16 = smov 128   ;;  %s419_s20 = smov 8  }
  0x39   : > { %270 = dma.vmem_to_hbm [thread:$0]  (%p480_p11), %s177_s10, 1024, %s179_s17, %s164_s30, %s418_s16, %s418_s16, %s419_s20  }
  0x3a PF: > { %s193_s21 = sand.u32 1, %s402_s6   ;;  %p564_p7 = scmp.ge.s32.totalorder %s414_s9, 2 }
  0x3b   : > { %s194_s22 = scalar_lea.sflag [#allocation4], %s193_s21 }
  0x3c   : > { %p277_p5 = pnand %p564_p7, %p484_p12 }
  0x3e   : > { %p278_p8 = pneg %p277_p5 }
  0x40   : > { %397 = dma.done.wait (%p278_p8), %s194_s22, 1024  }
  0x41   : > { %399 = vsyncadd (%p278_p8), %s194_s22, 4294966272  ;;  %p14_p10 = scmp.ge.s32.totalorder %s455_s12, 4   ;;  %s565_s6 = smov %s406_s7 }
  0x42   : > { %s566_s7 = smov %s410_s8  ;;  %s567_s8 = smov %s467_s15 }
  0x43   : > { %s568_s9 = smov %s455_s12  ;;  %16 = sbr.rel (!%p14_p10) target bundleno = 5 (0x5), region = 69 }
  0x48   :  { %200 = vsyncpa [#allocation3], 1 }
  0x49   :  { %202 = vsyncpa [#allocation3 + $0x1], 1 }
  0x4a   :  { %203 = vsyncpa [#allocation4], 1 }
  0x4b   :  { %205 = vsyncpa [#allocation4 + $0x1], 1 }

</bundles_post_ra>
